<compile_context>
chip_gen: v5e
topology: v5e:2x2
jax: 0.10.0
libtpu: 0.0.40
codegen_flags: <defaults>
</compile_context>

<pallas_src>
import math
from functools import partial

import jax
import jax.numpy as jnp
from jax.experimental import pallas as pl
from jax.experimental.pallas import tpu as pltpu


def _round_up(a, b):
    return (a + b - 1) // b * b


def _tile_bytes(sub, lane, itemsize):
    """Approximate VMEM bytes of a (sub, lane) block after (sublane,128) tiling."""
    pack = max(1, 4 // itemsize)                       # sub-32-bit sublane packing
    return _round_up(max(sub, 1), 8 * pack) * _round_up(max(lane, 1), 128) * itemsize


def _conv_kernel(x_ref, w_ref, b_ref, o_ref, acc_ref, *,
                 kh, kw, wp, tile_lanes, single_tile):
    """One (image, output-row-tile) step of the fused reflection-pad conv.

    x_ref:   (C_in_p, Hpp*Wp)     bf16 flattened padded image, resident per image
    w_ref:   (kh*kw, C_out, C_in_p) bf16 weights, resident
    b_ref:   (C_out, 1)           f32 bias
    o_ref:   (C_out, th*Wp)       lane-dense output tile (flattened rows on lanes)
    acc_ref: (C_out, th*Wp)       f32 VMEM accumulator scratch
    """
    if single_tile:
        base = 0                                              # fully static offsets
    else:
        # th*Wp is a multiple of 128 in the multi-tile path, so the dynamic part
        # of every tap offset is 128-aligned; the unaligned remainder is static.
        base = pl.multiple_of(pl.program_id(1) * tile_lanes, 128)

    # Init accumulator with the broadcast bias (saves a separate add).
    acc_ref[...] = jnp.broadcast_to(b_ref[...], acc_ref.shape)

    # kh*kw shifted (C_out, C_in) @ (C_in, th*Wp) MXU accumulations.  The lane
    # positions whose window wraps across a row boundary produce values that
    # the wrapper slices off, so no masking is needed here.
    for i in range(kh):
        for j in range(kw):
            xs = x_ref[:, pl.ds(base + i * wp + j, tile_lanes)]   # (C_in_p, th*Wp)
            acc_ref[...] += jnp.dot(w_ref[i * kw + j], xs,
                                    preferred_element_type=jnp.float32)

    o_ref[...] = acc_ref[...].astype(o_ref.dtype)


def conv_layer_forward(x, weight, bias, stride):
    """ReflectionPad2d(kernel//2) + Conv2d(stride) forward (PyTorch ConvLayer).

    x:      (N, C_in, H, W)        NCHW
    weight: (C_out, C_in, kh, kw)  OIHW
    bias:   (C_out,)
    Returns (N, C_out, H_out, W_out) NCHW.
    """
    N, C_in, H, W = x.shape
    C_out, _, kh, kw = weight.shape
    ph, pw = kh // 2, kw // 2

    # Reflection pad directly in NCHW (no layout transpose anywhere).
    xp = jnp.pad(x, ((0, 0), (0, 0), (ph, ph), (pw, pw)), mode="reflect")
    Hp, Wp = H + 2 * ph, W + 2 * pw

    # Stride-1 output geometry; stride > 1 handled by subsampling at the end.
    H1 = Hp - kh + 1
    W1 = Wp - kw + 1

    # ---- Tile selection ----------------------------------------------------
    # Each output tile is th rows flattened onto lanes: th*Wpad lanes.  For
    # T > 1 that product must be a multiple of 128, so we right-pad the width
    # to a multiple of 8 (row-tile unit <= 16, avoiding the odd-width blow-up);
    # small maps take a single tile with no padding / alignment constraint.
    target_lanes = 2048
    w8 = _round_up(Wp, 8)
    unit = 128 // math.gcd(128, w8)                        # <= 16
    th_try = _round_up(max(1, target_lanes // w8), unit)
    if th_try >= H1:
        Wpad, th, T = Wp, H1, 1
    else:
        Wpad, th = w8, th_try
        T = -(-H1 // th)
    Hov = T * th
    L = th * Wpad                                          # lanes per output tile

    # Bottom zero rows: row tiles plus the flat-index halo over-read (up to
    # kw-1 lanes into row Hov+kh-1) must stay in bounds.  The extra rows /
    # columns only feed outputs that get sliced off below.
    Hpp = Hov + kh
    pad_rows = Hpp - Hp
    pad_cols = Wpad - Wp
    C_in_p = _round_up(C_in, 8)
    xp = jnp.pad(xp, ((0, 0), (0, C_in_p - C_in), (0, pad_rows), (0, pad_cols)))

    # bf16 operands for the MXU; accumulation stays f32 inside the kernel.
    xf = xp.astype(jnp.bfloat16).reshape(N, C_in_p, Hpp * Wpad)   # free reshape
    # (kh*kw, C_out, C_in_p): tap-major weights, channels on the contraction dim.
    w2 = jnp.transpose(weight, (2, 3, 0, 1)).reshape(kh * kw, C_out, C_in)
    w2 = jnp.pad(w2, ((0, 0), (0, 0), (0, C_in_p - C_in))).astype(jnp.bfloat16)
    b2 = bias.reshape(C_out, 1).astype(jnp.float32)

    kernel = partial(_conv_kernel, kh=kh, kw=kw, wp=Wpad, tile_lanes=L,
                     single_tile=(T == 1))

    # ---- VMEM accounting: tiled/padded block sizes, per-generation clamp ----
    out_isz = jnp.dtype(x.dtype).itemsize
    x_blk = _tile_bytes(C_in_p, Hpp * Wpad, 2)             # resident padded image
    w_blk = kh * kw * _tile_bytes(C_out, C_in_p, 2)
    b_blk = _tile_bytes(C_out, 1, 4)
    o_blk = _tile_bytes(C_out, L, out_isz)
    acc_blk = _tile_bytes(C_out, L, 4)
    est = 2 * (x_blk + w_blk + b_blk + o_blk) + acc_blk    # in/out double-buffered
    try:
        vmem_cap = int(pltpu.get_tpu_info().vmem_capacity_bytes)
    except Exception:  # pragma: no cover - conservative fallback
        vmem_cap = 64 * 2 ** 20
    vmem_limit = int(min(max(int(1.25 * est) + (4 << 20), 32 << 20),
                         int(0.75 * vmem_cap)))
    # TODO(synk): for feature maps whose padded image exceeds ~half of VMEM
    # (mostly v7x, 64 MiB) switch the x spec to a (th+kh-1)-row halo window /
    # manual DMA instead of keeping the whole image resident.

    out = pl.pallas_call(
        kernel,
        out_shape=jax.ShapeDtypeStruct((N, C_out, Hov * Wpad), x.dtype),
        grid_spec=pltpu.PrefetchScalarGridSpec(
            num_scalar_prefetch=0,
            grid=(N, T),
            in_specs=[
                # Whole flattened padded image; block index constant across the
                # row-tile axis -> fetched from HBM once per image, kept resident.
                pl.BlockSpec((None, C_in_p, Hpp * Wpad), lambda n, t: (n, 0, 0)),
                pl.BlockSpec((kh * kw, C_out, C_in_p), lambda n, t: (0, 0, 0)),
                pl.BlockSpec((C_out, 1), lambda n, t: (0, 0)),
            ],
            out_specs=pl.BlockSpec((None, C_out, L), lambda n, t: (n, 0, t)),
            scratch_shapes=[pltpu.VMEM((C_out, L), jnp.float32)],
        ),
        compiler_params=pltpu.CompilerParams(
            # Row tiles write disjoint output blocks -> both axes are safe to
            # shard across TensorCores (helps v7x megacore even at batch 1).
            dimension_semantics=("parallel", "parallel"),
            vmem_limit_bytes=vmem_limit,
        ),
    )(xf, w2, b2)

    # Drop padded rows and the wrap-around / padding columns (already NCHW).
    out = out.reshape(N, C_out, Hov, Wpad)[:, :, :H1, :W1]
    # TODO(synk): stride > 1 is computed as the stride-1 conv + subsample
    # (correct but does s^2 extra work); a native strided kernel would use a
    # phase-decomposed (space-to-depth) tap layout instead.
    if stride != 1:
        out = out[:, :, ::stride, ::stride]
    return out


if __name__ == "__main__":
    # Shapes consistent with ConvLayer(4, 8, kernel_size=3, stride=1).
    N, C_in, H, W = 2, 4, 16, 16
    C_out, ksize, stride = 8, 3, 1

    key = jax.random.PRNGKey(0)
    kx, kwgt, kb = jax.random.split(key, 3)

    x = jax.random.normal(kx, (N, C_in, H, W), dtype=jnp.float32)

    fan_in = C_in * ksize * ksize
    bound = 1.0 / (fan_in ** 0.5)
    weight = jax.random.uniform(kwgt, (C_out, C_in, ksize, ksize),
                                minval=-bound, maxval=bound, dtype=jnp.float32)
    bias = jax.random.uniform(kb, (C_out,),
                              minval=-bound, maxval=bound, dtype=jnp.float32)

    fwd = jax.jit(conv_layer_forward, static_argnames=("stride",))
    out = fwd(x, weight, bias, stride=stride)
    out = jax.block_until_ready(out)

    # Reference: XLA conv on the reflection-padded f32 input.
    xp_ref = jnp.pad(x, ((0, 0), (0, 0), (ksize // 2,) * 2, (ksize // 2,) * 2),
                     mode="reflect")
    ref = jax.lax.conv_general_dilated(
        xp_ref, weight, (stride, stride), "VALID",
        dimension_numbers=("NCHW", "OIHW", "NCHW")) + bias[None, :, None, None]
    assert out.shape == ref.shape, (out.shape, ref.shape)
    # bf16 operands (f32 accumulate) in the kernel -> loose tolerance vs f32 ref.
    err = float(jnp.max(jnp.abs(out - ref)))
    assert jnp.allclose(out, ref, atol=5e-2, rtol=5e-2), err

    print("KERNEL_OK")
</pallas_src>

<mosaic_0001>
module attributes {stable_mosaic.version = 11 : i64} {
  func.func @_conv_kernel(%arg0: i32, %arg1: i32, %arg2: memref<1x8x342xbf16, #tpu.memory_space<vmem>>, %arg3: memref<9x8x8xbf16, #tpu.memory_space<vmem>>, %arg4: memref<8x1xf32, #tpu.memory_space<vmem>>, %arg5: memref<1x8x288xf32, #tpu.memory_space<vmem>>, %arg6: memref<8x288xf32, #tpu.memory_space<vmem>>) attributes {dimension_semantics = [#tpu.dimension_semantics<parallel>, #tpu.dimension_semantics<parallel>], iteration_bounds = array<i64: 2, 1>, scalar_prefetch = 0 : i64, scratch_operands = 1 : i64, tpu.core_type = #tpu.core_type<tc>, window_params = [{transform_indices = @transform_0, window_bounds = array<i64: 1, 8, 342>}, {pipeline_mode = #tpu.pipeline_mode<synchronous>, transform_indices = @transform_1, window_bounds = array<i64: 9, 8, 8>}, {pipeline_mode = #tpu.pipeline_mode<synchronous>, transform_indices = @transform_2, window_bounds = array<i64: 8, 1>}, {transform_indices = @transform_3, window_bounds = array<i64: 1, 8, 288>}]} {
    %c0 = arith.constant 0 : index
    %c0_0 = arith.constant 0 : index
    %0 = vector.load %arg4[%c0, %c0_0] : memref<8x1xf32, #tpu.memory_space<vmem>>, vector<8x1xf32>
    %1 = vector.shape_cast %0 : vector<8x1xf32> to vector<8x1xf32>
    %2 = vector.broadcast %1 : vector<8x1xf32> to vector<8x288xf32>
    %c0_1 = arith.constant 0 : index
    %c0_2 = arith.constant 0 : index
    %3 = vector.load %arg6[%c0_1, %c0_2] : memref<8x288xf32, #tpu.memory_space<vmem>>, vector<8x288xf32>
    tpu.vector_store %arg6[%c0_1, %c0_2], %2 {strides = array<i32>} : memref<8x288xf32, #tpu.memory_space<vmem>>, vector<8x288xf32>,
    %c0_3 = arith.constant 0 : index
    %c0_4 = arith.constant 0 : index
    %c0_5 = arith.constant 0 : index
    %4 = vector.load %arg2[%c0_3, %c0_4, %c0_5] : memref<1x8x342xbf16, #tpu.memory_space<vmem>>, vector<1x8x288xbf16>
    %5 = vector.shape_cast %4 : vector<1x8x288xbf16> to vector<8x288xbf16>
    %c0_6 = arith.constant 0 : index
    %c0_7 = arith.constant 0 : index
    %6 = vector.load %arg6[%c0_6, %c0_7] : memref<8x288xf32, #tpu.memory_space<vmem>>, vector<8x288xf32>
    %c0_8 = arith.constant 0 : index
    %c0_9 = arith.constant 0 : index
    %c0_10 = arith.constant 0 : index
    %7 = vector.load %arg3[%c0_8, %c0_9, %c0_10] : memref<9x8x8xbf16, #tpu.memory_space<vmem>>, vector<1x8x8xbf16>
    %8 = vector.shape_cast %7 : vector<1x8x8xbf16> to vector<8x8xbf16>
    %cst = arith.constant dense<0.000000e+00> : vector<8x288xf32>
    %9 = tpu.matmul %8, %5, %cst {dimension_numbers = #tpu.dot_dimension_numbers<[1], [0], [0], [1], [0, 0, 1, 1], [], []>} : vector<8x8xbf16>, vector<8x288xbf16>, vector<8x288xf32> -> vector<8x288xf32>
    %10 = arith.addf %6, %9 : vector<8x288xf32>
    %c0_11 = arith.constant 0 : index
    %c0_12 = arith.constant 0 : index
    %11 = vector.load %arg6[%c0_11, %c0_12] : memref<8x288xf32, #tpu.memory_space<vmem>>, vector<8x288xf32>
    tpu.vector_store %arg6[%c0_11, %c0_12], %10 {strides = array<i32>} : memref<8x288xf32, #tpu.memory_space<vmem>>, vector<8x288xf32>,
    %c0_13 = arith.constant 0 : index
    %c0_14 = arith.constant 0 : index
    %c1 = arith.constant 1 : index
    %12 = vector.load %arg2[%c0_13, %c0_14, %c1] : memref<1x8x342xbf16, #tpu.memory_space<vmem>>, vector<1x8x288xbf16>
    %13 = vector.shape_cast %12 : vector<1x8x288xbf16> to vector<8x288xbf16>
    %c0_15 = arith.constant 0 : index
    %c0_16 = arith.constant 0 : index
    %14 = vector.load %arg6[%c0_15, %c0_16] : memref<8x288xf32, #tpu.memory_space<vmem>>, vector<8x288xf32>
    %c1_17 = arith.constant 1 : index
    %c0_18 = arith.constant 0 : index
    %c0_19 = arith.constant 0 : index
    %15 = vector.load %arg3[%c1_17, %c0_18, %c0_19] : memref<9x8x8xbf16, #tpu.memory_space<vmem>>, vector<1x8x8xbf16>
    %16 = vector.shape_cast %15 : vector<1x8x8xbf16> to vector<8x8xbf16>
    %cst_20 = arith.constant dense<0.000000e+00> : vector<8x288xf32>
    %17 = tpu.matmul %16, %13, %cst_20 {dimension_numbers = #tpu.dot_dimension_numbers<[1], [0], [0], [1], [0, 0, 1, 1], [], []>} : vector<8x8xbf16>, vector<8x288xbf16>, vector<8x288xf32> -> vector<8x288xf32>
    %18 = arith.addf %14, %17 : vector<8x288xf32>
    %c0_21 = arith.constant 0 : index
    %c0_22 = arith.constant 0 : index
    %19 = vector.load %arg6[%c0_21, %c0_22] : memref<8x288xf32, #tpu.memory_space<vmem>>, vector<8x288xf32>
    tpu.vector_store %arg6[%c0_21, %c0_22], %18 {strides = array<i32>} : memref<8x288xf32, #tpu.memory_space<vmem>>, vector<8x288xf32>,
    %c0_23 = arith.constant 0 : index
    %c0_24 = arith.constant 0 : index
    %c2 = arith.constant 2 : index
    %20 = vector.load %arg2[%c0_23, %c0_24, %c2] : memref<1x8x342xbf16, #tpu.memory_space<vmem>>, vector<1x8x288xbf16>
    %21 = vector.shape_cast %20 : vector<1x8x288xbf16> to vector<8x288xbf16>
    %c0_25 = arith.constant 0 : index
    %c0_26 = arith.constant 0 : index
    %22 = vector.load %arg6[%c0_25, %c0_26] : memref<8x288xf32, #tpu.memory_space<vmem>>, vector<8x288xf32>
    %c2_27 = arith.constant 2 : index
    %c0_28 = arith.constant 0 : index
    %c0_29 = arith.constant 0 : index
    %23 = vector.load %arg3[%c2_27, %c0_28, %c0_29] : memref<9x8x8xbf16, #tpu.memory_space<vmem>>, vector<1x8x8xbf16>
    %24 = vector.shape_cast %23 : vector<1x8x8xbf16> to vector<8x8xbf16>
    %cst_30 = arith.constant dense<0.000000e+00> : vector<8x288xf32>
    %25 = tpu.matmul %24, %21, %cst_30 {dimension_numbers = #tpu.dot_dimension_numbers<[1], [0], [0], [1], [0, 0, 1, 1], [], []>} : vector<8x8xbf16>, vector<8x288xbf16>, vector<8x288xf32> -> vector<8x288xf32>
    %26 = arith.addf %22, %25 : vector<8x288xf32>
    %c0_31 = arith.constant 0 : index
    %c0_32 = arith.constant 0 : index
    %27 = vector.load %arg6[%c0_31, %c0_32] : memref<8x288xf32, #tpu.memory_space<vmem>>, vector<8x288xf32>
    tpu.vector_store %arg6[%c0_31, %c0_32], %26 {strides = array<i32>} : memref<8x288xf32, #tpu.memory_space<vmem>>, vector<8x288xf32>,
    %c0_33 = arith.constant 0 : index
    %c0_34 = arith.constant 0 : index
    %c18 = arith.constant 18 : index
    %28 = vector.load %arg2[%c0_33, %c0_34, %c18] : memref<1x8x342xbf16, #tpu.memory_space<vmem>>, vector<1x8x288xbf16>
    %29 = vector.shape_cast %28 : vector<1x8x288xbf16> to vector<8x288xbf16>
    %c0_35 = arith.constant 0 : index
    %c0_36 = arith.constant 0 : index
    %30 = vector.load %arg6[%c0_35, %c0_36] : memref<8x288xf32, #tpu.memory_space<vmem>>, vector<8x288xf32>
    %c3 = arith.constant 3 : index
    %c0_37 = arith.constant 0 : index
    %c0_38 = arith.constant 0 : index
    %31 = vector.load %arg3[%c3, %c0_37, %c0_38] : memref<9x8x8xbf16, #tpu.memory_space<vmem>>, vector<1x8x8xbf16>
    %32 = vector.shape_cast %31 : vector<1x8x8xbf16> to vector<8x8xbf16>
    %cst_39 = arith.constant dense<0.000000e+00> : vector<8x288xf32>
    %33 = tpu.matmul %32, %29, %cst_39 {dimension_numbers = #tpu.dot_dimension_numbers<[1], [0], [0], [1], [0, 0, 1, 1], [], []>} : vector<8x8xbf16>, vector<8x288xbf16>, vector<8x288xf32> -> vector<8x288xf32>
    %34 = arith.addf %30, %33 : vector<8x288xf32>
    %c0_40 = arith.constant 0 : index
    %c0_41 = arith.constant 0 : index
    %35 = vector.load %arg6[%c0_40, %c0_41] : memref<8x288xf32, #tpu.memory_space<vmem>>, vector<8x288xf32>
    tpu.vector_store %arg6[%c0_40, %c0_41], %34 {strides = array<i32>} : memref<8x288xf32, #tpu.memory_space<vmem>>, vector<8x288xf32>,
    %c0_42 = arith.constant 0 : index
    %c0_43 = arith.constant 0 : index
    %c19 = arith.constant 19 : index
    %36 = vector.load %arg2[%c0_42, %c0_43, %c19] : memref<1x8x342xbf16, #tpu.memory_space<vmem>>, vector<1x8x288xbf16>
    %37 = vector.shape_cast %36 : vector<1x8x288xbf16> to vector<8x288xbf16>
    %c0_44 = arith.constant 0 : index
    %c0_45 = arith.constant 0 : index
    %38 = vector.load %arg6[%c0_44, %c0_45] : memref<8x288xf32, #tpu.memory_space<vmem>>, vector<8x288xf32>
    %c4 = arith.constant 4 : index
    %c0_46 = arith.constant 0 : index
    %c0_47 = arith.constant 0 : index
    %39 = vector.load %arg3[%c4, %c0_46, %c0_47] : memref<9x8x8xbf16, #tpu.memory_space<vmem>>, vector<1x8x8xbf16>
    %40 = vector.shape_cast %39 : vector<1x8x8xbf16> to vector<8x8xbf16>
    %cst_48 = arith.constant dense<0.000000e+00> : vector<8x288xf32>
    %41 = tpu.matmul %40, %37, %cst_48 {dimension_numbers = #tpu.dot_dimension_numbers<[1], [0], [0], [1], [0, 0, 1, 1], [], []>} : vector<8x8xbf16>, vector<8x288xbf16>, vector<8x288xf32> -> vector<8x288xf32>
    %42 = arith.addf %38, %41 : vector<8x288xf32>
    %c0_49 = arith.constant 0 : index
    %c0_50 = arith.constant 0 : index
    %43 = vector.load %arg6[%c0_49, %c0_50] : memref<8x288xf32, #tpu.memory_space<vmem>>, vector<8x288xf32>
    tpu.vector_store %arg6[%c0_49, %c0_50], %42 {strides = array<i32>} : memref<8x288xf32, #tpu.memory_space<vmem>>, vector<8x288xf32>,
    %c0_51 = arith.constant 0 : index
    %c0_52 = arith.constant 0 : index
    %c20 = arith.constant 20 : index
    %44 = vector.load %arg2[%c0_51, %c0_52, %c20] : memref<1x8x342xbf16, #tpu.memory_space<vmem>>, vector<1x8x288xbf16>
    %45 = vector.shape_cast %44 : vector<1x8x288xbf16> to vector<8x288xbf16>
    %c0_53 = arith.constant 0 : index
    %c0_54 = arith.constant 0 : index
    %46 = vector.load %arg6[%c0_53, %c0_54] : memref<8x288xf32, #tpu.memory_space<vmem>>, vector<8x288xf32>
    %c5 = arith.constant 5 : index
    %c0_55 = arith.constant 0 : index
    %c0_56 = arith.constant 0 : index
    %47 = vector.load %arg3[%c5, %c0_55, %c0_56] : memref<9x8x8xbf16, #tpu.memory_space<vmem>>, vector<1x8x8xbf16>
    %48 = vector.shape_cast %47 : vector<1x8x8xbf16> to vector<8x8xbf16>
    %cst_57 = arith.constant dense<0.000000e+00> : vector<8x288xf32>
    %49 = tpu.matmul %48, %45, %cst_57 {dimension_numbers = #tpu.dot_dimension_numbers<[1], [0], [0], [1], [0, 0, 1, 1], [], []>} : vector<8x8xbf16>, vector<8x288xbf16>, vector<8x288xf32> -> vector<8x288xf32>
    %50 = arith.addf %46, %49 : vector<8x288xf32>
    %c0_58 = arith.constant 0 : index
    %c0_59 = arith.constant 0 : index
    %51 = vector.load %arg6[%c0_58, %c0_59] : memref<8x288xf32, #tpu.memory_space<vmem>>, vector<8x288xf32>
    tpu.vector_store %arg6[%c0_58, %c0_59], %50 {strides = array<i32>} : memref<8x288xf32, #tpu.memory_space<vmem>>, vector<8x288xf32>,
    %c0_60 = arith.constant 0 : index
    %c0_61 = arith.constant 0 : index
    %c36 = arith.constant 36 : index
    %52 = vector.load %arg2[%c0_60, %c0_61, %c36] : memref<1x8x342xbf16, #tpu.memory_space<vmem>>, vector<1x8x288xbf16>
    %53 = vector.shape_cast %52 : vector<1x8x288xbf16> to vector<8x288xbf16>
    %c0_62 = arith.constant 0 : index
    %c0_63 = arith.constant 0 : index
    %54 = vector.load %arg6[%c0_62, %c0_63] : memref<8x288xf32, #tpu.memory_space<vmem>>, vector<8x288xf32>
    %c6 = arith.constant 6 : index
    %c0_64 = arith.constant 0 : index
    %c0_65 = arith.constant 0 : index
    %55 = vector.load %arg3[%c6, %c0_64, %c0_65] : memref<9x8x8xbf16, #tpu.memory_space<vmem>>, vector<1x8x8xbf16>
    %56 = vector.shape_cast %55 : vector<1x8x8xbf16> to vector<8x8xbf16>
    %cst_66 = arith.constant dense<0.000000e+00> : vector<8x288xf32>
    %57 = tpu.matmul %56, %53, %cst_66 {dimension_numbers = #tpu.dot_dimension_numbers<[1], [0], [0], [1], [0, 0, 1, 1], [], []>} : vector<8x8xbf16>, vector<8x288xbf16>, vector<8x288xf32> -> vector<8x288xf32>
    %58 = arith.addf %54, %57 : vector<8x288xf32>
    %c0_67 = arith.constant 0 : index
    %c0_68 = arith.constant 0 : index
    %59 = vector.load %arg6[%c0_67, %c0_68] : memref<8x288xf32, #tpu.memory_space<vmem>>, vector<8x288xf32>
    tpu.vector_store %arg6[%c0_67, %c0_68], %58 {strides = array<i32>} : memref<8x288xf32, #tpu.memory_space<vmem>>, vector<8x288xf32>,
    %c0_69 = arith.constant 0 : index
    %c0_70 = arith.constant 0 : index
    %c37 = arith.constant 37 : index
    %60 = vector.load %arg2[%c0_69, %c0_70, %c37] : memref<1x8x342xbf16, #tpu.memory_space<vmem>>, vector<1x8x288xbf16>
    %61 = vector.shape_cast %60 : vector<1x8x288xbf16> to vector<8x288xbf16>
    %c0_71 = arith.constant 0 : index
    %c0_72 = arith.constant 0 : index
    %62 = vector.load %arg6[%c0_71, %c0_72] : memref<8x288xf32, #tpu.memory_space<vmem>>, vector<8x288xf32>
    %c7 = arith.constant 7 : index
    %c0_73 = arith.constant 0 : index
    %c0_74 = arith.constant 0 : index
    %63 = vector.load %arg3[%c7, %c0_73, %c0_74] : memref<9x8x8xbf16, #tpu.memory_space<vmem>>, vector<1x8x8xbf16>
    %64 = vector.shape_cast %63 : vector<1x8x8xbf16> to vector<8x8xbf16>
    %cst_75 = arith.constant dense<0.000000e+00> : vector<8x288xf32>
    %65 = tpu.matmul %64, %61, %cst_75 {dimension_numbers = #tpu.dot_dimension_numbers<[1], [0], [0], [1], [0, 0, 1, 1], [], []>} : vector<8x8xbf16>, vector<8x288xbf16>, vector<8x288xf32> -> vector<8x288xf32>
    %66 = arith.addf %62, %65 : vector<8x288xf32>
    %c0_76 = arith.constant 0 : index
    %c0_77 = arith.constant 0 : index
    %67 = vector.load %arg6[%c0_76, %c0_77] : memref<8x288xf32, #tpu.memory_space<vmem>>, vector<8x288xf32>
    tpu.vector_store %arg6[%c0_76, %c0_77], %66 {strides = array<i32>} : memref<8x288xf32, #tpu.memory_space<vmem>>, vector<8x288xf32>,
    %c0_78 = arith.constant 0 : index
    %c0_79 = arith.constant 0 : index
    %c38 = arith.constant 38 : index
    %68 = vector.load %arg2[%c0_78, %c0_79, %c38] : memref<1x8x342xbf16, #tpu.memory_space<vmem>>, vector<1x8x288xbf16>
    %69 = vector.shape_cast %68 : vector<1x8x288xbf16> to vector<8x288xbf16>
    %c0_80 = arith.constant 0 : index
    %c0_81 = arith.constant 0 : index
    %70 = vector.load %arg6[%c0_80, %c0_81] : memref<8x288xf32, #tpu.memory_space<vmem>>, vector<8x288xf32>
    %c8 = arith.constant 8 : index
    %c0_82 = arith.constant 0 : index
    %c0_83 = arith.constant 0 : index
    %71 = vector.load %arg3[%c8, %c0_82, %c0_83] : memref<9x8x8xbf16, #tpu.memory_space<vmem>>, vector<1x8x8xbf16>
    %72 = vector.shape_cast %71 : vector<1x8x8xbf16> to vector<8x8xbf16>
    %cst_84 = arith.constant dense<0.000000e+00> : vector<8x288xf32>
    %73 = tpu.matmul %72, %69, %cst_84 {dimension_numbers = #tpu.dot_dimension_numbers<[1], [0], [0], [1], [0, 0, 1, 1], [], []>} : vector<8x8xbf16>, vector<8x288xbf16>, vector<8x288xf32> -> vector<8x288xf32>
    %74 = arith.addf %70, %73 : vector<8x288xf32>
    %c0_85 = arith.constant 0 : index
    %c0_86 = arith.constant 0 : index
    %75 = vector.load %arg6[%c0_85, %c0_86] : memref<8x288xf32, #tpu.memory_space<vmem>>, vector<8x288xf32>
    tpu.vector_store %arg6[%c0_85, %c0_86], %74 {strides = array<i32>} : memref<8x288xf32, #tpu.memory_space<vmem>>, vector<8x288xf32>,
    %c0_87 = arith.constant 0 : index
    %c0_88 = arith.constant 0 : index
    %76 = vector.load %arg6[%c0_87, %c0_88] : memref<8x288xf32, #tpu.memory_space<vmem>>, vector<8x288xf32>
    %c0_89 = arith.constant 0 : index
    %c0_90 = arith.constant 0 : index
    %c0_91 = arith.constant 0 : index
    %77 = vector.load %arg5[%c0_89, %c0_90, %c0_91] : memref<1x8x288xf32, #tpu.memory_space<vmem>>, vector<1x8x288xf32>
    %78 = vector.shape_cast %77 : vector<1x8x288xf32> to vector<8x288xf32>
    %79 = vector.shape_cast %76 : vector<8x288xf32> to vector<1x8x288xf32>
    tpu.vector_store %arg5[%c0_89, %c0_90, %c0_91], %79 {strides = array<i32>} : memref<1x8x288xf32, #tpu.memory_space<vmem>>, vector<1x8x288xf32>,
    return
  }
  func.func @transform_0(%arg0: i32, %arg1: i32) -> (i32, i32, i32) {
    %c0_i32 = arith.constant 0 : i32
    %c0_i32_0 = arith.constant 0 : i32
    %c0_i32_1 = arith.constant 0 : i32
    return %arg0, %c0_i32, %c0_i32_0 : i32, i32, i32
  }
  func.func @transform_1(%arg0: i32, %arg1: i32) -> (i32, i32, i32) {
    %c0_i32 = arith.constant 0 : i32
    %c0_i32_0 = arith.constant 0 : i32
    %c0_i32_1 = arith.constant 0 : i32
    %c0_i32_2 = arith.constant 0 : i32
    return %c0_i32, %c0_i32_0, %c0_i32_1 : i32, i32, i32
  }
  func.func @transform_2(%arg0: i32, %arg1: i32) -> (i32, i32) {
    %c0_i32 = arith.constant 0 : i32
    %c0_i32_0 = arith.constant 0 : i32
    %c0_i32_1 = arith.constant 0 : i32
    return %c0_i32, %c0_i32_0 : i32, i32
  }
  func.func @transform_3(%arg0: i32, %arg1: i32) -> (i32, i32, i32) {
    %c0_i32 = arith.constant 0 : i32
    %c0_i32_0 = arith.constant 0 : i32
    return %arg0, %c0_i32, %arg1 : i32, i32, i32
  }
}

</mosaic_0001>

<bundles_post_ra>
// kernel: conv_layer_forward.1
= control target key start
LH: loop header
LB: loop body
LE: loop exit
PB: predicated region body
PF: predicated region fallthrough
CT: control target
= control target key end

     0   :  { %s1146_s12 = smov 0   ;;  %s1148_s13 = smov 0   ;;  %s1290_s0 = inlined_call_operand.vmem [shape: bf16[2,8,342], index: 0, kind: input, shape index: {}]   ;;  %s1291_s1 = inlined_call_operand.vmem [shape: bf16[9,8,8], index: 1, kind: input, shape index: {}]   ;;  %s1292_s2 = inlined_call_operand.vmem [shape: f32[8,1], index: 2, kind: input, shape index: {}]   ;;  %s1293_s3 = inlined_call_operand.vmem [shape: f32[2,8,288], index: 3, kind: output, shape index: {}]  }
   0x1   :  { %s1150_s14 = smov 0  }
   0x2 LB: > { %s25_s15 = sadd.s32 1, %s1111_s13  ;;  %p1017_p0 = scmp.ge.s32.totalorder %s1115_s14, 1  ;;  %s1115_s14 = sphi %s1150_s14, %s13_s14   ;;  %s1111_s13 = sphi %s1148_s13, %s1295_s13   ;;  %s1107_s12 = sphi %s1146_s12, %s1294_s12  }
   0x3   : > { %p27_p1 = scmp.ge.s32.totalorder %s25_s15, 2  ;;  %p151_p2 = scmp.lt.s32.totalorder %s1115_s14, 3 }
   0x5   : > { %s1297_s15 = smov (%p27_p1, %s25_s15), 0  ;;  %p152_p3 = pnand %p1017_p0, %p151_p2 }
   0x6   : > { %p179_p4 = scmp.lt.s32.totalorder (!%p152_p3), %s1107_s12, 1  ;;  %s1117_s20 = smov (!%p152_p3), 126  }
   0x7   : > { %155 = sbr.rel (%p152_p3) target bundleno = 382 (0x17e), region = 32  ;;  %s1118_s21 = smov (!%p152_p3), 127  }
   0x8   : > { %s1119_s22 = smov (!%p152_p3), 110   ;;  %s1120_s23 = smov (!%p152_p3), 109  }
   0x9   : > { %s1121_s24 = smov (!%p152_p3), 108   ;;  %s1122_s25 = smov (!%p152_p3), 92  }
   0xa   : > { %s1123_s26 = smov (!%p152_p3), 91   ;;  %s1124_s27 = smov (!%p152_p3), 90  }
   0xc   : > { %s1299_s12 = smov (!%p179_p4, %s1107_s12), 1  ;;  %vm223_vm0 = vcmask 1043456   ;;  %v210_v32 = vld [vmem:[%s1291_s1] sm:$0xf]  ;;  %vm219_vm1 = vcmask 64512   ;;  %v1125_v40 = vmov 0  }
   0xd   : > { %s1057_s16 = smul.u32 12, %s1299_s12  ;;  %v1023_v38 = vld [vmem:[%s1291_s1 + $0x4] sm:$0xf]  ;;  %1092 = vset.pattern.permute.xlu0 %v1125_v40  ;;  %vm299_vm2 = vcmask 1039360   ;;  %vm380_vm3 = vcmask 1031168   ;;  %vm461_vm4 = vcmask 900096  }
   0xe   : > { %v195_v39 = vld [vmem:[%s1292_s2] sm:$0xff]  ;;  %v1027_v56 = vld [vmem:[%s1291_s1 + $0x8] sm:$0xf]  ;;  %vm542_vm5 = vcmask 891904   ;;  %vm623_vm6 = vcmask 883712   ;;  %vm704_vm7 = vcmask 752640  }
   0xf   : > { %s1170_s19 = scalar_lea.vmem %s1290_s0, %s1057_s16  ;;  %vm785_vm8 = vcmask 744448   ;;  %vm866_vm9 = vcmask 736256   ;;  %v1043_v40 = vld [vmem:[%s1291_s1 + $0x18] sm:$0xf]  ;;  %vm203_vm10 = vcmask 261120  }
  0x10   : > { %v359_v0 = vld [vmem:[%s1170_s19] sm:$0xff]  ;;  %v279_v1 = vld [vmem:[%s1170_s19 + $0x8] sm:$0xf] }
  0x11   : > { %v368_v2 = vunpack.c.l.b16 %v359_v0  ;;  %v289_v3 = vunpack.c.l.b16 %v279_v1  ;;  %v360_v6 = vld [vmem:[%s1170_s19 + $0x8] sm:$0xf]  ;;  %v369_v7 = vunpack.c.h.b16 %v359_v0  ;;  %v1031_v1 = vld [vmem:[%s1291_s1 + $0xc] sm:$0xf] }
  0x12   : > { %v370_v8 = vunpack.c.l.b16 %v360_v6  ;;  %v441_v10 = vld [vmem:[%s1170_s19 + $0x8] sm:$0xf] }
  0x13   : > { %v371_v4 = vpack.c.b16 %v368_v2, %v368_v2  ;;  %v292_v5 = vpack.c.b16 %v289_v3, %v289_v3  ;;  %v372_v9 = vpack.c.b16 %v369_v7, %v369_v7  ;;  %v451_v12 = vunpack.c.l.b16 %v441_v10  ;;  %v522_v14 = vld [vmem:[%s1170_s19 + $0x8] sm:$0xf] }
  0x14   : > { %v373_v11 = vpack.c.b16 %v370_v8, %v370_v8  ;;  %v532_v15 = vunpack.c.l.b16 %v522_v14  ;;  %v603_v18 = vld [vmem:[%s1170_s19 + $0x8] sm:$0xf]  ;;  %v1035_v14 = vld [vmem:[%s1291_s1 + $0x10] sm:$0xf] }
  0x15   : > { %374 = vrot.lane.b32.xlu1 %v371_v4, %s1117_s20  ;;  %293 = vrot.lane.b32.xlu0 %v371_v4, %s1118_s21  ;;  %v454_v13 = vpack.c.b16 %v451_v12, %v451_v12  ;;  %v225_v17 = vsel %vm223_vm0, %v371_v4, 0  ;;  %v684_v19 = vld [vmem:[%s1170_s19 + $0x8] sm:$0xf]  ;;  %v613_v20 = vunpack.c.l.b16 %v603_v18  ;;  %v228_v30 = vsel %vm223_vm0, %v372_v9, 0 }
  0x16   : > { %297 = vrot.lane.b32.xlu2 %v292_v5, %s1118_s21  ;;  %v535_v16 = vpack.c.b16 %v532_v15, %v532_v15  ;;  %240 = vmatpush.bf16.msra.mxu0 %v225_v17  ;;  %v694_v21 = vunpack.c.l.b16 %v684_v19  ;;  %v765_v23 = vld [vmem:[%s1170_s19 + $0x8] sm:$0xf] }
  0x17   : > { %v616_v22 = vpack.c.b16 %v613_v20, %v613_v20  ;;  %v775_v25 = vunpack.c.l.b16 %v765_v23  ;;  %v846_v27 = vld [vmem:[%s1170_s19 + $0x8] sm:$0xf]  ;;  %253 = vmatpush.bf16.msra.mxu1 %v228_v30 }
  0x18   : > { %v697_v24 = vpack.c.b16 %v694_v21, %v694_v21  ;;  %v856_v28 = vunpack.c.l.b16 %v846_v27  ;;  %v206_v31 = vld [vmem:[%s1170_s19 + $0x8] sm:$0xf] }
  0x19   : > { %v778_v26 = vpack.c.b16 %v775_v25, %v775_v25  ;;  %v215_v33 = vunpack.c.l.b16 %v206_v31  ;;  %1020 = vmatmul.msk.bf16.vlgmr.msra.gmra.mxu0 %vm219_vm1, %v210_v32 }
  0x1a   : > { %v859_v29 = vpack.c.b16 %v856_v28, %v856_v28  ;;  %1021 = vmatmul.msk.bf16.vlgmr.msra.gmra.mxu1 %vm219_vm1, %v210_v32 }
  0x1b   : > { %v218_v34 = vpack.c.b16 %v215_v33, %v215_v33  ;;  %v1039_v33 = vld [vmem:[%s1291_s1 + $0x14] sm:$0xf] }
  0x1d   : > { %376 = vrot.lane.b32.xlu1 %v372_v9, %s1117_s20  ;;  %295 = vrot.lane.b32.xlu0 %v372_v9, %s1118_s21  ;;  %v231_v35 = vsel %vm223_vm0, %v218_v34, 0 }
  0x1e   : > { %378 = vrot.lane.b32.xlu2 %v373_v11, %s1117_s20  ;;  %266 = vmatpush.bf16.msra.mxu2 %v231_v35 }
  0x21   : > { %1022 = vmatmul.msk.bf16.vlgmr.msra.gmra.mxu2 %vm219_vm1, %v210_v32 }
  0x25   : > { %459 = vrot.lane.b32.xlu1 %v454_v13, %s1119_s22  ;;  %457 = vrot.lane.b32.xlu0 %v372_v9, %s1119_s22 }
  0x26   : > { %455 = vrot.lane.b32.xlu2 %v371_v4, %s1119_s22 }
  0x2d   : > { %536 = vrot.lane.b32.xlu1 %v371_v4, %s1120_s23  ;;  %540 = vrot.lane.b32.xlu0 %v535_v16, %s1120_s23 }
  0x2e   : > { %538 = vrot.lane.b32.xlu2 %v372_v9, %s1120_s23 }
  0x35   : > { %619 = vrot.lane.b32.xlu1 %v372_v9, %s1121_s24  ;;  %617 = vrot.lane.b32.xlu0 %v371_v4, %s1121_s24 }
  0x36   : > { %698 = vrot.lane.b32.xlu2 %v371_v4, %s1122_s25 }
  0x3d   : > { %621 = vrot.lane.b32.xlu1 %v616_v22, %s1121_s24  ;;  %700 = vrot.lane.b32.xlu0 %v372_v9, %s1122_s25 }
  0x3e   : > { %702 = vrot.lane.b32.xlu2 %v697_v24, %s1122_s25  ;;  %s1058_s25 = smul.u32 24, %s1299_s12 }
  0x40   : > { %s192_s28 = scalar_lea.vmem %s1293_s3, %s1058_s25 }
  0x45   : > { %783 = vrot.lane.b32.xlu1 %v778_v26, %s1123_s26  ;;  %781 = vrot.lane.b32.xlu0 %v372_v9, %s1123_s26 }
  0x46   : > { %779 = vrot.lane.b32.xlu2 %v371_v4, %s1123_s26 }
  0x4d   : > { %864 = vrot.lane.b32.xlu0 %v859_v29, %s1124_s27  ;;  %860 = vrot.lane.b32.xlu1 %v371_v4, %s1124_s27 }
  0x4e   : > { %862 = vrot.lane.b32.xlu2 %v372_v9, %s1124_s27 }
  0x55   : > { %198 = vperm.xlu0 %1092, %v195_v39  }
  0x70   : > { %v298_v36 = vpop.permute.xlu2 %297 }
  0x71   : > { %v312_v37 = vsel %vm223_vm0, %v298_v36, 0 }
  0x72   : > { %347 = vmatpush.bf16.msrb.mxu1 %v312_v37 }
  0x75   : > { %1026 = vmatmul.msk.bf16.vlgmr.msrb.gmra.mxu1 %vm219_vm1, %v1023_v38 }
  0x78   : > { %v379_v41 = vpop.permute.xlu2 %378 }
  0x79   : > { %v393_v45 = vsel %vm223_vm0, %v379_v41, 0 }
  0x80   : > { %v456_v55 = vpop.permute.xlu2 %455 }
  0x87   : > { %v375_v42 = vpop.permute.xlu1 %374  ;;  %v294_v43 = vpop.permute.xlu0 %293 }
  0x88   : > { %v539_v0 = vpop.permute.xlu2 %538 }
  0x8f   : > { %v377_v44 = vpop.permute.xlu1 %376  ;;  %v296_v46 = vpop.permute.xlu0 %295 }
  0x90   : > { %v300_v47 = vsel %vm299_vm2, %v294_v43, %v296_v46  ;;  %v301_v48 = vsel %vm299_vm2, %v296_v46, %v298_v36  ;;  %v381_v49 = vsel %vm380_vm3, %v375_v42, %v377_v44  ;;  %v382_v50 = vsel %vm380_vm3, %v377_v44, %v379_v41  ;;  %v699_v9 = vpop.permute.xlu2 %698  ;;  %v1047_v44 = vld [vmem:[%s1291_s1 + $0x1c] sm:$0xf] }
  0x91   : > { %v306_v51 = vsel %vm223_vm0, %v300_v47, 0  ;;  %v309_v52 = vsel %vm223_vm0, %v301_v48, 0  ;;  %v387_v53 = vsel %vm223_vm0, %v381_v49, 0  ;;  %v390_v54 = vsel %vm223_vm0, %v382_v50, 0 }
  0x92   : > { %321 = vmatpush.bf16.msra.mxu3 %v306_v51  ;;  %334 = vmatpush.bf16.msrb.mxu0 %v309_v52 }
  0x93   : > { %402 = vmatpush.bf16.msrb.mxu2 %v387_v53 }
  0x95   : > { %1024 = vmatmul.msk.bf16.vlgmr.msra.gmra.mxu3 %vm219_vm1, %v1023_v38  ;;  %1025 = vmatmul.msk.bf16.vlgmr.msrb.gmra.mxu0 %vm219_vm1, %v1023_v38 }
  0x96   : > { %415 = vmatpush.bf16.msrb.mxu3 %v390_v54  ;;  %428 = vmatpush.bf16.msra.mxu0 %v393_v45  ;;  %v1051_v45 = vld [vmem:[%s1291_s1 + $0x20] sm:$0xf]  ;;  %v242_v46 = vpop.f32.mrf.mxu0 }
  0x97   : > { %1028 = vmatmul.msk.bf16.vlgmr.msrb.gmra.mxu2 %vm219_vm1, %v1027_v56  ;;  %v460_v57 = vpop.permute.xlu1 %459  ;;  %v458_v58 = vpop.permute.xlu0 %457 }
  0x98   : > { %v474_v59 = vsel %vm223_vm0, %v460_v57, 0  ;;  %v462_v60 = vsel %vm461_vm4, %v456_v55, %v458_v58  ;;  %v463_v61 = vsel %vm461_vm4, %v458_v58, %v460_v57  ;;  %v703_v15 = vpop.permute.xlu2 %702  ;;  %v255_v47 = vpop.f32.mrf.mxu1 }
  0x99   : > { %v468_v62 = vsel %vm223_vm0, %v462_v60, 0  ;;  %v471_v63 = vsel %vm223_vm0, %v463_v61, 0  ;;  %v717_v25 = vsel %vm223_vm0, %v703_v15, 0 }
  0x9a   : > { %509 = vmatpush.bf16.msra.mxu3 %v474_v59  ;;  %483 = vmatpush.bf16.msra.mxu1 %v468_v62 }
  0x9b   : > { %496 = vmatpush.bf16.msra.mxu2 %v471_v63 }
  0x9d   : > { %1032 = vmatmul.msk.bf16.vlgmr.msra.gmra.mxu1 %vm219_vm1, %v1031_v1 }
  0x9e   : > { %v244_v48 = vpop.f32.mrf.mxu0 }
  0x9f   : > { %v537_v2 = vpop.permute.xlu1 %536  ;;  %v541_v3 = vpop.permute.xlu0 %540 }
  0xa0   : > { %v543_v4 = vsel %vm542_vm5, %v537_v2, %v539_v0  ;;  %v544_v5 = vsel %vm542_vm5, %v539_v0, %v541_v3  ;;  %v555_v6 = vsel %vm223_vm0, %v541_v3, 0  ;;  %v780_v26 = vpop.permute.xlu2 %779  ;;  %v257_v49 = vpop.f32.mrf.mxu1 }
  0xa1   : > { %v549_v7 = vsel %vm223_vm0, %v543_v4, 0  ;;  %v552_v8 = vsel %vm223_vm0, %v544_v5, 0  ;;  %590 = vmatpush.bf16.msrb.mxu2 %v555_v6 }
  0xa2   : > { %564 = vmatpush.bf16.msrb.mxu0 %v549_v7  ;;  %577 = vmatpush.bf16.msrb.mxu1 %v552_v8 }
  0xa4   : > { %v268_v53 = vpop.f32.mrf.mxu2 }
  0xa5   : > { %1029 = vmatmul.msk.bf16.vlgmr.msrb.gmra.mxu3 %vm219_vm1, %v1027_v56  ;;  %1030 = vmatmul.msk.bf16.vlgmr.msra.gmra.mxu0 %vm219_vm1, %v1027_v56 }
  0xa7   : > { %1033 = vmatmul.msk.bf16.vlgmr.msra.gmra.mxu2 %vm219_vm1, %v1031_v1  ;;  %v620_v10 = vpop.permute.xlu1 %619  ;;  %v618_v11 = vpop.permute.xlu0 %617 }
  0xa8   : > { %v624_v12 = vsel %vm623_vm6, %v618_v11, %v620_v10  ;;  %v863_v34 = vpop.permute.xlu2 %862 }
  0xa9   : > { %v630_v13 = vsel %vm223_vm0, %v624_v12, 0 }
  0xaa   : > { %645 = vmatpush.bf16.msrb.mxu3 %v630_v13 }
  0xac   : > { %v270_v56 = vpop.f32.mrf.mxu2 }
  0xad   : > { %1037 = vmatmul.msk.bf16.vlgmr.msrb.gmra.mxu1 %vm219_vm1, %v1035_v14 }
  0xaf   : > { %v622_v16 = vpop.permute.xlu1 %621  ;;  %v701_v17 = vpop.permute.xlu0 %700 }
  0xb0   : > { %v625_v18 = vsel %vm623_vm6, %v620_v10, %v622_v16  ;;  %v636_v19 = vsel %vm223_vm0, %v622_v16, 0  ;;  %v705_v20 = vsel %vm704_vm7, %v699_v9, %v701_v17  ;;  %v706_v21 = vsel %vm704_vm7, %v701_v17, %v703_v15 }
  0xb1   : > { %v633_v22 = vsel %vm223_vm0, %v625_v18, 0  ;;  %v711_v23 = vsel %vm223_vm0, %v705_v20, 0  ;;  %671 = vmatpush.bf16.msra.mxu1 %v636_v19  ;;  %v714_v24 = vsel %vm223_vm0, %v706_v21, 0 }
  0xb2   : > { %658 = vmatpush.bf16.msra.mxu0 %v633_v22  ;;  %726 = vmatpush.bf16.msra.mxu2 %v711_v23 }
  0xb5   : > { %1034 = vmatmul.msk.bf16.vlgmr.msra.gmra.mxu3 %vm219_vm1, %v1031_v1  ;;  %1036 = vmatmul.msk.bf16.vlgmr.msrb.gmra.mxu0 %vm219_vm1, %v1035_v14 }
  0xb6   : > { %739 = vmatpush.bf16.msra.mxu3 %v714_v24  ;;  %752 = vmatpush.bf16.msrb.mxu0 %v717_v25 }
  0xb7   : > { %1038 = vmatmul.msk.bf16.vlgmr.msrb.gmra.mxu2 %vm219_vm1, %v1035_v14  ;;  %v784_v27 = vpop.permute.xlu1 %783  ;;  %v782_v28 = vpop.permute.xlu0 %781 }
  0xb8   : > { %v786_v29 = vsel %vm785_vm8, %v780_v26, %v782_v28  ;;  %v787_v30 = vsel %vm785_vm8, %v782_v28, %v784_v27  ;;  %v798_v41 = vsel %vm223_vm0, %v784_v27, 0 }
  0xb9   : > { %v792_v31 = vsel %vm223_vm0, %v786_v29, 0  ;;  %v795_v32 = vsel %vm223_vm0, %v787_v30, 0 }
  0xba   : > { %807 = vmatpush.bf16.msrb.mxu1 %v792_v31  ;;  %820 = vmatpush.bf16.msrb.mxu2 %v795_v32 }
  0xbd   : > { %1042 = vmatmul.msk.bf16.vlgmr.msra.gmra.mxu1 %vm219_vm1, %v1039_v33 }
  0xbf   : > { %v865_v35 = vpop.permute.xlu0 %864  ;;  %v861_v36 = vpop.permute.xlu1 %860 }
  0xc0   : > { %v868_v37 = vsel %vm866_vm9, %v863_v34, %v865_v35  ;;  %v867_v39 = vsel %vm866_vm9, %v861_v36, %v863_v34  ;;  %v879_v42 = vsel %vm223_vm0, %v865_v35, 0 }
  0xc1   : > { %v876_v38 = vsel %vm223_vm0, %v868_v37, 0  ;;  %v873_v43 = vsel %vm223_vm0, %v867_v39, 0 }
  0xc2   : > { %901 = vmatpush.bf16.msra.mxu1 %v876_v38 }
  0xc5   : > { %1040 = vmatmul.msk.bf16.vlgmr.msrb.gmra.mxu3 %vm219_vm1, %v1039_v33  ;;  %1041 = vmatmul.msk.bf16.vlgmr.msra.gmra.mxu0 %vm219_vm1, %v1039_v33 }
  0xc6   : > { %833 = vmatpush.bf16.msrb.mxu3 %v798_v41  ;;  %888 = vmatpush.bf16.msra.mxu0 %v873_v43 }
  0xc7   : > { %1044 = vmatmul.msk.bf16.vlgmr.msra.gmra.mxu2 %vm219_vm1, %v1043_v40  ;;  %v199_v50 = vpop.permute.xlu0 %198 }
  0xc8   : > { %914 = vmatpush.bf16.msra.mxu2 %v879_v42  ;;  %204 = vst.msk [vmem:[#allocation2 + $0x10] sm:$0xff] %vm203_vm10, %v199_v50  ;;  %v272_v51 = vadd.f32 %v242_v46, %v199_v50  ;;  %v273_v52 = vadd.f32 %v255_v47, %v199_v50 }
  0xcd   : > { %1048 = vmatmul.msk.bf16.vlgmr.msrb.gmra.mxu1 %vm219_vm1, %v1047_v44 }
  0xcf   : > { %v209_v54 = vld [vmem:[#allocation2 + $0x10] sm:$0xff] }
  0xd0   : > { %v274_v55 = vadd.f32 %v268_v53, %v209_v54 }
  0xd2   : > { %277 = vst.msk [vmem:[#allocation2 + $0x10] sm:$0xff] %vm203_vm10, %v274_v55 }
  0xd5   : > { %1045 = vmatmul.msk.bf16.vlgmr.msra.gmra.mxu3 %vm219_vm1, %v1043_v40  ;;  %1046 = vmatmul.msk.bf16.vlgmr.msrb.gmra.mxu0 %vm219_vm1, %v1043_v40 }
  0xd7   : > { %1049 = vmatmul.msk.bf16.vlgmr.msrb.gmra.mxu2 %vm219_vm1, %v1047_v44 }
  0xd9   : > { %v282_v59 = vld [vmem:[#allocation2 + $0x10] sm:$0xff] }
  0xdd   : > { %1053 = vmatmul.msk.bf16.vlgmr.msra.gmra.mxu1 %vm219_vm1, %v1051_v45 }
  0xe5   : > { %1050 = vmatmul.msk.bf16.vlgmr.msrb.gmra.mxu3 %vm219_vm1, %v1047_v44  ;;  %1052 = vmatmul.msk.bf16.vlgmr.msra.gmra.mxu0 %vm219_vm1, %v1051_v45 }
  0xe7   : > { %1054 = vmatmul.msk.bf16.vlgmr.msra.gmra.mxu2 %vm219_vm1, %v1051_v45 }
  0xf2   : > { %v349_v57 = vpop.f32.mrf.mxu1 }
  0xf3   : > { %v355_v60 = vadd.f32 %v349_v57, %v282_v59 }
  0xf5   : > { %358 = vst.msk [vmem:[#allocation2 + $0x10] sm:$0xff] %vm203_vm10, %v355_v60 }
  0xfa   : > { %v351_v58 = vpop.f32.mrf.mxu1 }
  0xfc   : > { %v363_v3 = vld [vmem:[#allocation2 + $0x10] sm:$0xff] }
 0x112   : > { %v336_v61 = vpop.f32.mrf.mxu0 }
 0x113   : > { %v354_v32 = vadd.f32 %v336_v61, %v273_v52 }
 0x118   : > { %v323_v62 = vpop.f32.mrf.mxu3 }
 0x119   : > { %v353_v34 = vadd.f32 %v323_v62, %v272_v51 }
 0x11a   : > { %v404_v63 = vpop.f32.mrf.mxu2  ;;  %v338_v0 = vpop.f32.mrf.mxu0 }
 0x11b   : > { %v485_v1 = vpop.f32.mrf.mxu1  ;;  %v434_v38 = vadd.f32 %v404_v63, %v353_v34 }
 0x11d   : > { %v515_v43 = vadd.f32 %v485_v1, %v434_v38 }
 0x120   : > { %v325_v2 = vpop.f32.mrf.mxu3 }
 0x122   : > { %v406_v4 = vpop.f32.mrf.mxu2  ;;  %v430_v5 = vpop.f32.mrf.mxu0 }
 0x123   : > { %v487_v6 = vpop.f32.mrf.mxu1  ;;  %v436_v7 = vadd.f32 %v430_v5, %v363_v3 }
 0x125   : > { %439 = vst.msk [vmem:[#allocation2 + $0x10] sm:$0xff] %vm203_vm10, %v436_v7 }
 0x128   : > { %v417_v8 = vpop.f32.mrf.mxu3 }
 0x129   : > { %v435_v35 = vadd.f32 %v417_v8, %v354_v32 }
 0x12a   : > { %v498_v9 = vpop.f32.mrf.mxu2  ;;  %v432_v10 = vpop.f32.mrf.mxu0 }
 0x12b   : > { %v579_v11 = vpop.f32.mrf.mxu1  ;;  %v516_v39 = vadd.f32 %v498_v9, %v435_v35 }
 0x12c   : > { %v444_v16 = vld [vmem:[#allocation2 + $0x10] sm:$0xff] }
 0x12d   : > { %v597_v44 = vadd.f32 %v579_v11, %v516_v39 }
 0x130   : > { %v419_v12 = vpop.f32.mrf.mxu3 }
 0x132   : > { %v500_v13 = vpop.f32.mrf.mxu2  ;;  %v566_v14 = vpop.f32.mrf.mxu0 }
 0x133   : > { %v581_v15 = vpop.f32.mrf.mxu1  ;;  %v596_v46 = vadd.f32 %v566_v14, %v515_v43 }
 0x138   : > { %v511_v17 = vpop.f32.mrf.mxu3 }
 0x139   : > { %v517_v18 = vadd.f32 %v511_v17, %v444_v16 }
 0x13a   : > { %v592_v19 = vpop.f32.mrf.mxu2  ;;  %v568_v20 = vpop.f32.mrf.mxu0 }
 0x13b   : > { %v673_v21 = vpop.f32.mrf.mxu1  ;;  %520 = vst.msk [vmem:[#allocation2 + $0x10] sm:$0xff] %vm203_vm10, %v517_v18 }
 0x140   : > { %v513_v22 = vpop.f32.mrf.mxu3 }
 0x142   : > { %v594_v23 = vpop.f32.mrf.mxu2  ;;  %v525_v24 = vld [vmem:[#allocation2 + $0x10] sm:$0xff]  ;;  %v660_v25 = vpop.f32.mrf.mxu0 }
 0x143   : > { %v675_v26 = vpop.f32.mrf.mxu1  ;;  %v598_v27 = vadd.f32 %v592_v19, %v525_v24  ;;  %v678_v47 = vadd.f32 %v660_v25, %v597_v44 }
 0x145   : > { %601 = vst.msk [vmem:[#allocation2 + $0x10] sm:$0xff] %vm203_vm10, %v598_v27 }
 0x148   : > { %v647_v28 = vpop.f32.mrf.mxu3 }
 0x149   : > { %v677_v50 = vadd.f32 %v647_v28, %v596_v46 }
 0x14a   : > { %v728_v29 = vpop.f32.mrf.mxu2  ;;  %v662_v30 = vpop.f32.mrf.mxu0 }
 0x14b   : > { %v809_v31 = vpop.f32.mrf.mxu1  ;;  %v758_v56 = vadd.f32 %v728_v29, %v677_v50 }
 0x14c   : > { %v606_v33 = vld [vmem:[#allocation2 + $0x10] sm:$0xff] }
 0x14d   : > { %v679_v36 = vadd.f32 %v673_v21, %v606_v33  ;;  %v839_v59 = vadd.f32 %v809_v31, %v758_v56 }
 0x14f   : > { %682 = vst.msk [vmem:[#allocation2 + $0x10] sm:$0xff] %vm203_vm10, %v679_v36 }
 0x150   : > { %v649_v37 = vpop.f32.mrf.mxu3 }
 0x152   : > { %v730_v40 = vpop.f32.mrf.mxu2  ;;  %v754_v41 = vpop.f32.mrf.mxu0 }
 0x153   : > { %v811_v42 = vpop.f32.mrf.mxu1 }
 0x156   : > { %v687_v45 = vld [vmem:[#allocation2 + $0x10] sm:$0xff] }
 0x157   : > { %v760_v48 = vadd.f32 %v754_v41, %v687_v45 }
 0x158   : > { %v741_v49 = vpop.f32.mrf.mxu3 }
 0x159   : > { %763 = vst.msk [vmem:[#allocation2 + $0x10] sm:$0xff] %vm203_vm10, %v760_v48  ;;  %v759_v51 = vadd.f32 %v741_v49, %v678_v47 }
 0x15a   : > { %v822_v52 = vpop.f32.mrf.mxu2  ;;  %v756_v53 = vpop.f32.mrf.mxu0 }
 0x15b   : > { %v903_v54 = vpop.f32.mrf.mxu1  ;;  %v840_v55 = vadd.f32 %v822_v52, %v759_v51 }
 0x15d   : > { %v921_v57 = vadd.f32 %v903_v54, %v840_v55 }
 0x15f   : > { %930 = vst [vmem:[%s192_s28 + $0x8] sm:$0xff] %v921_v57 }
 0x160   : > { %v743_v58 = vpop.f32.mrf.mxu3  ;;  %v768_v0 = vld [vmem:[#allocation2 + $0x10] sm:$0xff] }
 0x162   : > { %v824_v60 = vpop.f32.mrf.mxu2  ;;  %v890_v61 = vpop.f32.mrf.mxu0 }
 0x163   : > { %v905_v62 = vpop.f32.mrf.mxu1  ;;  %v920_v63 = vadd.f32 %v890_v61, %v839_v59 }
 0x165   : > { %929 = vst [vmem:[%s192_s28] sm:$0xff] %v920_v63 }
 0x168   : > { %v835_v1 = vpop.f32.mrf.mxu3 }
 0x169   : > { %v841_v2 = vadd.f32 %v835_v1, %v768_v0 }
 0x16a   : > { %v916_v3 = vpop.f32.mrf.mxu2  ;;  %v892_v4 = vpop.f32.mrf.mxu0 }
 0x16b   : > { %844 = vst.msk [vmem:[#allocation2 + $0x10] sm:$0xff] %vm203_vm10, %v841_v2 }
 0x170   : > { %v837_v5 = vpop.f32.mrf.mxu3 }
 0x172   : > { %v918_v6 = vpop.f32.mrf.mxu2  ;;  %v849_v7 = vld [vmem:[#allocation2 + $0x10] sm:$0xff] }
 0x173   : > { %v922_v8 = vadd.f32 %v916_v3, %v849_v7 }
 0x175   : > { %925 = vst.msk [vmem:[#allocation2 + $0x10] sm:$0xff] %vm203_vm10, %v922_v8 }
 0x17c   : > { %v928_v9 = vld [vmem:[#allocation2 + $0x10] sm:$0xff] }
 0x17d   : > { %931 = vst.msk [vmem:[%s192_s28 + $0x10] sm:$0xff] %vm203_vm10, %v928_v9 }
 0x17e PF: > { %s13_s14 = sadd.s32 1, %s1115_s14   ;;  %s1294_s12 = smov %s1111_s13 }
 0x17f   : > { %p10_p5 = scmp.ge.s32.totalorder %s13_s14, 4   ;;  %s1295_s13 = smov %s1297_s15 }
 0x181   :  { %12 = sbr.rel (!%p10_p5) target bundleno = 2 (0x2), region = 70 }

</bundles_post_ra>
